<compile_context>
chip_gen: v5e
topology: v5e:2x2
jax: 0.10.0
libtpu: 0.0.40
codegen_flags: <defaults>
</compile_context>

<pallas_src>
import math

import jax
import jax.numpy as jnp
from jax.experimental import pallas as pl
from jax.experimental.pallas import tpu as pltpu


def _round_up(n, m):
    return ((n + m - 1) // m) * m


def mlp_kernel(x_ref,
               w1_ref, b1_ref,
               w2_ref, b2_ref,
               w3_ref, b3_ref,
               w4_ref, b4_ref,
               o_ref):
    """Fused 4-layer MLP on a (features, batch_tile) tile.

    Batch sits on the lane axis; each layer computes h^T = W @ h_prev^T + b
    with f32 accumulation on the MXU.  ReLU (VPU, f32) is immediately followed
    by a cast back to the MXU compute dtype so large intermediates live in
    VMEM at half width when compute_dtype is bf16.
    """
    cdt = w1_ref.dtype                       # MXU input dtype (bf16 or f32)
    x = x_ref[...]                           # (6, TB), already compute dtype

    h = jnp.dot(w1_ref[...], x, preferred_element_type=jnp.float32) + b1_ref[...]
    h = jnp.maximum(h, 0.0).astype(cdt)      # (32, TB)

    h = jnp.dot(w2_ref[...], h, preferred_element_type=jnp.float32) + b2_ref[...]
    h = jnp.maximum(h, 0.0).astype(cdt)      # (64, TB)

    h = jnp.dot(w3_ref[...], h, preferred_element_type=jnp.float32) + b3_ref[...]
    h = jnp.maximum(h, 0.0).astype(cdt)      # (32, TB)

    h = jnp.dot(w4_ref[...], h, preferred_element_type=jnp.float32) + b4_ref[...]
    o_ref[...] = h.astype(o_ref.dtype)       # (6, TB)


def cbb_linear_forward(x, params, *, batch_tile=16384, compute_dtype=jnp.bfloat16):
    """Run the fused MLP Pallas kernel.

    x: (B, 6) float32, any B (ragged last block handled by Pallas masking).
    params: dict with w1..w4 of shape (out_features, in_features)  [torch layout]
            and b1..b4 of shape (out_features, 1), all float32.
    """
    B, F_in = x.shape
    assert F_in == 6
    assert batch_tile % 128 == 0, "batch_tile must be a multiple of 128"
    F_out = params["w4"].shape[0]

    # Tile-size selection:
    #  * never exceed the requested batch_tile (VMEM budget),
    #  * if the batch is big enough, make sure there are >= 2 grid steps so the
    #    "parallel" batch axis can shard across v7x's two TensorCores,
    #  * for tiny batches collapse to a single full-array block (allowed even
    #    when B is not a multiple of 128).
    bt = batch_tile
    if B > 2 * 128:
        bt = min(bt, _round_up(pl.cdiv(B, 2), 128))
    if bt >= B:
        bt = B
    num_tiles = pl.cdiv(B, bt)

    # Batch-on-lanes: present x as (features, batch).  No padding: Pallas masks
    # the ragged last block (out-of-range columns produce garbage that is never
    # written back; there are no cross-column reductions in the kernel).
    x_t = x.T.astype(compute_dtype)                    # (6, B)

    def bcast_map(i):
        return (0, 0)

    weight_specs = []
    weight_args = []
    for k in range(1, 5):
        w = params[f"w{k}"].astype(compute_dtype)      # (out, in), MXU dtype
        b = params[f"b{k}"].astype(jnp.float32)        # (out, 1), f32 bias add
        weight_specs.append(pl.BlockSpec(w.shape, bcast_map))
        weight_specs.append(pl.BlockSpec(b.shape, bcast_map))
        weight_args.append(w)
        weight_args.append(b)

    # 2 * (6*32 + 32*64 + 64*32 + 32*6) = 8960 flops per batch element.
    flops = 8960 * B
    bytes_accessed = (
        x_t.size * x_t.dtype.itemsize            # input read
        + F_out * B * 4                          # f32 output write
        + sum(a.size * a.dtype.itemsize for a in weight_args))

    out_t = pl.pallas_call(
        mlp_kernel,
        out_shape=jax.ShapeDtypeStruct((F_out, B), jnp.float32),
        grid_spec=pltpu.PrefetchScalarGridSpec(
            num_scalar_prefetch=0,
            grid=(num_tiles,),
            in_specs=[pl.BlockSpec((F_in, bt), lambda i: (0, i))]
                     + weight_specs,
            out_specs=pl.BlockSpec((F_out, bt), lambda i: (0, i)),
        ),
        compiler_params=pltpu.CompilerParams(
            dimension_semantics=("parallel",),
            vmem_limit_bytes=48 * 1024 * 1024),
        cost_estimate=pl.CostEstimate(
            flops=flops, transcendentals=0, bytes_accessed=bytes_accessed),
    )(x_t, *weight_args)

    # Return batch-major like the PyTorch module.
    return out_t.T.astype(x.dtype)


def init_params(key):
    """Deterministic init mimicking PyTorch nn.Linear default (uniform +/- 1/sqrt(fan_in)).

    Weights stored in PyTorch-native (out_features, in_features) layout.
    """
    dims = [(6, 32), (32, 64), (64, 32), (32, 6)]
    params = {}
    for idx, (fan_in, fan_out) in enumerate(dims, start=1):
        key, kw, kb = jax.random.split(key, 3)
        bound = 1.0 / math.sqrt(fan_in)
        params[f"w{idx}"] = jax.random.uniform(
            kw, (fan_out, fan_in), jnp.float32, minval=-bound, maxval=bound)
        params[f"b{idx}"] = jax.random.uniform(
            kb, (fan_out, 1), jnp.float32, minval=-bound, maxval=bound)
    return params


def reference_forward(x, params, compute_dtype=jnp.float32):
    """Plain JAX reference matching the PyTorch module (y = x @ W^T + b)."""
    h = x
    for k, act in ((1, True), (2, True), (3, True), (4, False)):
        w = params[f"w{k}"].astype(compute_dtype)
        b = params[f"b{k}"][:, 0]
        h = jnp.dot(h.astype(compute_dtype), w.T,
                    preferred_element_type=jnp.float32) + b
        if act:
            h = jnp.maximum(h, 0.0)
    return h


if __name__ == "__main__":
    key = jax.random.PRNGKey(0)
    key, kx = jax.random.split(key)

    # Small, intentionally ragged batch: exercises the 2-tile grid with a
    # masked last block (tiles of 256 columns, second block only 44 valid).
    B = 300
    x = jax.random.normal(kx, (B, 6), dtype=jnp.float32)
    params = init_params(key)

    # Production path: bf16 MXU inputs, f32 accumulation.
    out_bf16 = jax.block_until_ready(
        cbb_linear_forward(x, params, compute_dtype=jnp.bfloat16))
    # f32 path for a faithful check against the PyTorch-equivalent reference.
    out_f32 = jax.block_until_ready(
        cbb_linear_forward(x, params, compute_dtype=jnp.float32))

    # Also exercise the tiny-batch (single full-array block) path.
    x_small = x[:8]
    out_small = jax.block_until_ready(
        cbb_linear_forward(x_small, params, compute_dtype=jnp.float32))

    ref_f32 = reference_forward(x, params, compute_dtype=jnp.float32)
    ref_bf16 = reference_forward(x, params, compute_dtype=jnp.bfloat16)
    ref_small = reference_forward(x_small, params, compute_dtype=jnp.float32)

    assert out_bf16.shape == (B, 6)
    assert out_f32.shape == (B, 6)
    assert out_small.shape == (8, 6)
    # f32 kernel vs f32 reference: tight.
    assert jnp.allclose(out_f32, ref_f32, atol=1e-4, rtol=1e-4), "f32 mismatch vs reference"
    assert jnp.allclose(out_small, ref_small, atol=1e-4, rtol=1e-4), "small-batch mismatch"
    # bf16 kernel vs reference computed with the same bf16 casting: tight-ish.
    assert jnp.allclose(out_bf16, ref_bf16, atol=1e-3, rtol=1e-3), "bf16 mismatch vs matched reference"
    # bf16 kernel vs pure-f32 reference: loose sanity check on the numerics change.
    assert jnp.allclose(out_bf16, ref_f32, atol=5e-2, rtol=5e-2), "bf16 drift vs f32 reference"

    print("KERNEL_OK")
</pallas_src>

<mosaic_0001>
module attributes {stable_mosaic.version = 11 : i64} {
  func.func @mlp_kernel(%arg0: i32, %arg1: memref<6x256xbf16, #tpu.memory_space<vmem>>, %arg2: memref<32x6xbf16, #tpu.memory_space<vmem>>, %arg3: memref<32x1xf32, #tpu.memory_space<vmem>>, %arg4: memref<64x32xbf16, #tpu.memory_space<vmem>>, %arg5: memref<64x1xf32, #tpu.memory_space<vmem>>, %arg6: memref<32x64xbf16, #tpu.memory_space<vmem>>, %arg7: memref<32x1xf32, #tpu.memory_space<vmem>>, %arg8: memref<6x32xbf16, #tpu.memory_space<vmem>>, %arg9: memref<6x1xf32, #tpu.memory_space<vmem>>, %arg10: memref<6x256xf32, #tpu.memory_space<vmem>>) attributes {dimension_semantics = [#tpu.dimension_semantics<parallel>], iteration_bounds = array<i64: 2>, scalar_prefetch = 0 : i64, scratch_operands = 0 : i64, tpu.core_type = #tpu.core_type<tc>, window_params = [{transform_indices = @transform_0, window_bounds = array<i64: 6, 256>}, {pipeline_mode = #tpu.pipeline_mode<synchronous>, transform_indices = @transform_1, window_bounds = array<i64: 32, 6>}, {pipeline_mode = #tpu.pipeline_mode<synchronous>, transform_indices = @transform_2, window_bounds = array<i64: 32, 1>}, {pipeline_mode = #tpu.pipeline_mode<synchronous>, transform_indices = @transform_3, window_bounds = array<i64: 64, 32>}, {pipeline_mode = #tpu.pipeline_mode<synchronous>, transform_indices = @transform_4, window_bounds = array<i64: 64, 1>}, {pipeline_mode = #tpu.pipeline_mode<synchronous>, transform_indices = @transform_5, window_bounds = array<i64: 32, 64>}, {pipeline_mode = #tpu.pipeline_mode<synchronous>, transform_indices = @transform_6, window_bounds = array<i64: 32, 1>}, {pipeline_mode = #tpu.pipeline_mode<synchronous>, transform_indices = @transform_7, window_bounds = array<i64: 6, 32>}, {pipeline_mode = #tpu.pipeline_mode<synchronous>, transform_indices = @transform_8, window_bounds = array<i64: 6, 1>}, {transform_indices = @transform_9, window_bounds = array<i64: 6, 256>}]} {
    %c0 = arith.constant 0 : index
    %c0_0 = arith.constant 0 : index
    %0 = vector.load %arg1[%c0, %c0_0] : memref<6x256xbf16, #tpu.memory_space<vmem>>, vector<6x256xbf16>
    %c0_1 = arith.constant 0 : index
    %c0_2 = arith.constant 0 : index
    %1 = vector.load %arg2[%c0_1, %c0_2] : memref<32x6xbf16, #tpu.memory_space<vmem>>, vector<32x6xbf16>
    %cst = arith.constant dense<0.000000e+00> : vector<32x256xf32>
    %2 = tpu.matmul %1, %0, %cst {dimension_numbers = #tpu.dot_dimension_numbers<[1], [0], [0], [1], [0, 0, 1, 1], [], []>} : vector<32x6xbf16>, vector<6x256xbf16>, vector<32x256xf32> -> vector<32x256xf32>
    %c0_3 = arith.constant 0 : index
    %c0_4 = arith.constant 0 : index
    %3 = vector.load %arg3[%c0_3, %c0_4] : memref<32x1xf32, #tpu.memory_space<vmem>>, vector<32x1xf32>
    %4 = vector.broadcast %3 : vector<32x1xf32> to vector<32x256xf32>
    %5 = arith.addf %2, %4 : vector<32x256xf32>
    %cst_5 = arith.constant 0.000000e+00 : f32
    %6 = vector.broadcast %cst_5 : f32 to vector<32x256xf32>
    %7 = arith.maximumf %5, %6 : vector<32x256xf32>
    %8 = arith.truncf %7 : vector<32x256xf32> to vector<32x256xbf16>
    %c0_6 = arith.constant 0 : index
    %c0_7 = arith.constant 0 : index
    %9 = vector.load %arg4[%c0_6, %c0_7] : memref<64x32xbf16, #tpu.memory_space<vmem>>, vector<64x32xbf16>
    %cst_8 = arith.constant dense<0.000000e+00> : vector<64x256xf32>
    %10 = tpu.matmul %9, %8, %cst_8 {dimension_numbers = #tpu.dot_dimension_numbers<[1], [0], [0], [1], [0, 0, 1, 1], [], []>} : vector<64x32xbf16>, vector<32x256xbf16>, vector<64x256xf32> -> vector<64x256xf32>
    %c0_9 = arith.constant 0 : index
    %c0_10 = arith.constant 0 : index
    %11 = vector.load %arg5[%c0_9, %c0_10] : memref<64x1xf32, #tpu.memory_space<vmem>>, vector<64x1xf32>
    %12 = vector.broadcast %11 : vector<64x1xf32> to vector<64x256xf32>
    %13 = arith.addf %10, %12 : vector<64x256xf32>
    %cst_11 = arith.constant 0.000000e+00 : f32
    %14 = vector.broadcast %cst_11 : f32 to vector<64x256xf32>
    %15 = arith.maximumf %13, %14 : vector<64x256xf32>
    %16 = arith.truncf %15 : vector<64x256xf32> to vector<64x256xbf16>
    %c0_12 = arith.constant 0 : index
    %c0_13 = arith.constant 0 : index
    %17 = vector.load %arg6[%c0_12, %c0_13] : memref<32x64xbf16, #tpu.memory_space<vmem>>, vector<32x64xbf16>
    %cst_14 = arith.constant dense<0.000000e+00> : vector<32x256xf32>
    %18 = tpu.matmul %17, %16, %cst_14 {dimension_numbers = #tpu.dot_dimension_numbers<[1], [0], [0], [1], [0, 0, 1, 1], [], []>} : vector<32x64xbf16>, vector<64x256xbf16>, vector<32x256xf32> -> vector<32x256xf32>
    %c0_15 = arith.constant 0 : index
    %c0_16 = arith.constant 0 : index
    %19 = vector.load %arg7[%c0_15, %c0_16] : memref<32x1xf32, #tpu.memory_space<vmem>>, vector<32x1xf32>
    %20 = vector.broadcast %19 : vector<32x1xf32> to vector<32x256xf32>
    %21 = arith.addf %18, %20 : vector<32x256xf32>
    %cst_17 = arith.constant 0.000000e+00 : f32
    %22 = vector.broadcast %cst_17 : f32 to vector<32x256xf32>
    %23 = arith.maximumf %21, %22 : vector<32x256xf32>
    %24 = arith.truncf %23 : vector<32x256xf32> to vector<32x256xbf16>
    %c0_18 = arith.constant 0 : index
    %c0_19 = arith.constant 0 : index
    %25 = vector.load %arg8[%c0_18, %c0_19] : memref<6x32xbf16, #tpu.memory_space<vmem>>, vector<6x32xbf16>
    %cst_20 = arith.constant dense<0.000000e+00> : vector<6x256xf32>
    %26 = tpu.matmul %25, %24, %cst_20 {dimension_numbers = #tpu.dot_dimension_numbers<[1], [0], [0], [1], [0, 0, 1, 1], [], []>} : vector<6x32xbf16>, vector<32x256xbf16>, vector<6x256xf32> -> vector<6x256xf32>
    %c0_21 = arith.constant 0 : index
    %c0_22 = arith.constant 0 : index
    %27 = vector.load %arg9[%c0_21, %c0_22] : memref<6x1xf32, #tpu.memory_space<vmem>>, vector<6x1xf32>
    %28 = vector.broadcast %27 : vector<6x1xf32> to vector<6x256xf32>
    %29 = arith.addf %26, %28 : vector<6x256xf32>
    %c0_23 = arith.constant 0 : index
    %c0_24 = arith.constant 0 : index
    %30 = vector.load %arg10[%c0_23, %c0_24] : memref<6x256xf32, #tpu.memory_space<vmem>>, vector<6x256xf32>
    tpu.vector_store %arg10[%c0_23, %c0_24], %29 {strides = array<i32>} : memref<6x256xf32, #tpu.memory_space<vmem>>, vector<6x256xf32>,
    return
  }
  func.func @transform_0(%arg0: i32) -> (i32, i32) {
    %c0_i32 = arith.constant 0 : i32
    %c0_i32_0 = arith.constant 0 : i32
    return %c0_i32, %arg0 : i32, i32
  }
  func.func @transform_1(%arg0: i32) -> (i32, i32) {
    %c0_i32 = arith.constant 0 : i32
    %c0_i32_0 = arith.constant 0 : i32
    %c0_i32_1 = arith.constant 0 : i32
    return %c0_i32, %c0_i32_0 : i32, i32
  }
  func.func @transform_2(%arg0: i32) -> (i32, i32) {
    %c0_i32 = arith.constant 0 : i32
    %c0_i32_0 = arith.constant 0 : i32
    %c0_i32_1 = arith.constant 0 : i32
    return %c0_i32, %c0_i32_0 : i32, i32
  }
  func.func @transform_3(%arg0: i32) -> (i32, i32) {
    %c0_i32 = arith.constant 0 : i32
    %c0_i32_0 = arith.constant 0 : i32
    %c0_i32_1 = arith.constant 0 : i32
    return %c0_i32, %c0_i32_0 : i32, i32
  }
  func.func @transform_4(%arg0: i32) -> (i32, i32) {
    %c0_i32 = arith.constant 0 : i32
    %c0_i32_0 = arith.constant 0 : i32
    %c0_i32_1 = arith.constant 0 : i32
    return %c0_i32, %c0_i32_0 : i32, i32
  }
  func.func @transform_5(%arg0: i32) -> (i32, i32) {
    %c0_i32 = arith.constant 0 : i32
    %c0_i32_0 = arith.constant 0 : i32
    %c0_i32_1 = arith.constant 0 : i32
    return %c0_i32, %c0_i32_0 : i32, i32
  }
  func.func @transform_6(%arg0: i32) -> (i32, i32) {
    %c0_i32 = arith.constant 0 : i32
    %c0_i32_0 = arith.constant 0 : i32
    %c0_i32_1 = arith.constant 0 : i32
    return %c0_i32, %c0_i32_0 : i32, i32
  }
  func.func @transform_7(%arg0: i32) -> (i32, i32) {
    %c0_i32 = arith.constant 0 : i32
    %c0_i32_0 = arith.constant 0 : i32
    %c0_i32_1 = arith.constant 0 : i32
    return %c0_i32, %c0_i32_0 : i32, i32
  }
  func.func @transform_8(%arg0: i32) -> (i32, i32) {
    %c0_i32 = arith.constant 0 : i32
    %c0_i32_0 = arith.constant 0 : i32
    %c0_i32_1 = arith.constant 0 : i32
    return %c0_i32, %c0_i32_0 : i32, i32
  }
  func.func @transform_9(%arg0: i32) -> (i32, i32) {
    %c0_i32 = arith.constant 0 : i32
    %c0_i32_0 = arith.constant 0 : i32
    return %c0_i32, %arg0 : i32, i32
  }
}

</mosaic_0001>

<bundles_post_ra>
// kernel: tpu_custom_call.1
= control target key start
LH: loop header
LB: loop body
LE: loop exit
PB: predicated region body
PF: predicated region fallthrough
CT: control target
= control target key end

     0   :  { %s1295_s0 = inlined_call_operand.vmem [shape: bf16[6,300], index: 0, kind: input, shape index: {}]   ;;  %s1296_s1 = inlined_call_operand.vmem [shape: bf16[32,6], index: 1, kind: input, shape index: {}]   ;;  %s1297_s2 = inlined_call_operand.vmem [shape: f32[32,1], index: 2, kind: input, shape index: {}]   ;;  %s1298_s3 = inlined_call_operand.vmem [shape: bf16[64,32], index: 3, kind: input, shape index: {}]   ;;  %s1299_s4 = inlined_call_operand.vmem [shape: f32[64,1], index: 4, kind: input, shape index: {}]   ;;  %s1300_s5 = inlined_call_operand.vmem [shape: bf16[32,64], index: 5, kind: input, shape index: {}]   ;;  %s1301_s6 = inlined_call_operand.vmem [shape: f32[32,1], index: 6, kind: input, shape index: {}]   ;;  %s1302_s7 = inlined_call_operand.vmem [shape: bf16[6,32], index: 7, kind: input, shape index: {}]   ;;  %s1303_s8 = inlined_call_operand.vmem [shape: f32[6,1], index: 8, kind: input, shape index: {}]   ;;  %s1304_s9 = inlined_call_operand.hbm [shape: f32[6,300], index: 9, kind: output, shape index: {}]  }
   0x1   :  { %1306 = sst [smem:[#allocation5_spill]] %s1295_s0 }
   0x2   :  { %1307 = sst [smem:[#allocation6_spill]] %s1296_s1 }
   0x3   :  { %14 = vsyncpa [#allocation3], 0 }
   0x4   :  { %16 = vsyncpa [#allocation3 + $0x1], 0  ;;  %s1098_s30 = smov 0   ;;  %s1100_s10 = smov 0  }
   0x5   :  { %s1102_s11 = smov 0   ;;  %s1104_s12 = smov 0  }
   0x6 LB: > { %s1119_s13 = sadd.s32 4294967295, %s1044_s12   ;;  %s854_s14 = sadd.s32 4294967294, %s1044_s12   ;;  %s1044_s12 = sphi %s1104_s12, %s1317_s12   ;;  %s1040_s11 = sphi %s1102_s11, %s1316_s11   ;;  %s1036_s10 = sphi %s1100_s10, %s1315_s10   ;;  %s1032_s30 = sphi %s1098_s30, %s1314_s30  }
   0x7   : > { %s1123_s15 = sadd.s32 1, %s1044_s12   ;;  %s223_s16 = sadd.s32 1, %s1040_s11 }
   0x8   : > { %s220_s17 = ssub.s32 %s1044_s12, %s1123_s15  ;;  %p233_p0 = scmp.ne.s32.totalorder %s1040_s11, %s1036_s10 }
   0x9   : > { %p221_p1 = scmp.eq.s32.totalorder %s220_s17, 0  ;;  %p234_p2 = scmp.eq.s32.totalorder %s1119_s13, 1 }
   0xa   : > { %p239_p3 = scmp.ne.s32.totalorder %s1036_s10, %s1032_s30  ;;  %p240_p4 = scmp.eq.s32.totalorder %s854_s14, 1 }
   0xb   : > { %s1134_s18 = scalar_select %p221_p1, %s1040_s11, %s223_s16  }
   0xc   : > { %p1136_p5 = por %p234_p2, %p233_p0  ;;  %p1140_p6 = por %p240_p4, %p239_p3 }
   0xd   : > { %p857_p7 = scmp.ge.s32.totalorder %s1044_s12, 1  ;;  %p299_p8 = scmp.lt.s32.totalorder %s1044_s12, 3 }
   0xf   : > { %p300_p9 = pnand %p857_p7, %p299_p8 }
  0x10   : > { %s1153_s25 = sshll.u32 (!%p300_p9), %s1119_s13, 1  ;;  %s1310_s0 = sld [smem:[#allocation5_spill]] (!%p300_p9) }
  0x11   : > { %303 = sbr.rel (%p300_p9) target bundleno = 736 (0x2e0), region = 56  ;;  %p344_p10 = scmp.lt.s32.totalorder (!%p300_p9), %s1153_s25, 2 }
  0x12   : > { %s1311_s1 = sld [smem:[#allocation6_spill]] (!%p300_p9)  ;;  %s336_s23 = sand.u32 (!%p300_p9), 1, %s1036_s10  }
  0x13   : > { %s858_s24 = sshll.u32 (!%p300_p9), %s336_s23, 4 }
  0x16   : > { %v366_v0 = vld [vmem:[%s1297_s2 + $0x10] sm:$0xff]  ;;  %v364_v1 = vld [vmem:[%s1297_s2] sm:$0xff]  ;;  %v1046_v2 = vmov 0   ;;  %s345_s26 = scalar_select %p344_p10, %s1153_s25, 2  ;;  %v367_v3 = vld [vmem:[%s1297_s2 + $0x18] sm:$0xff]  ;;  %vm410_vm0 = vcmask 1042432  }
  0x17   : > { %968 = vset.pattern.permute.xlu0 %v1046_v2  ;;  %969 = vset.pattern.permute.xlu1 %v1046_v2  ;;  %v365_v5 = vld [vmem:[%s1297_s2 + $0x8] sm:$0xff]  ;;  %vm403_vm1 = vcmask 48128   ;;  %v479_v13 = vld [vmem:[%s1299_s4 + $0x20] sm:$0xff]  ;;  %v478_v15 = vld [vmem:[%s1299_s4 + $0x18] sm:$0xff]  ;;  %vm543_vm2 = vcmask 261120   ;;  %vm676_vm3 = vcmask 523264  }
  0x18   : > { %380 = vperm.xlu0 %968, %v366_v0   ;;  %370 = vperm.xlu1 %969, %v364_v1   ;;  %s860_s27 = sshll.u32 %s345_s26, 2  ;;  %v920_v12 = vld [vmem:[%s1311_s1] sm:$0xff]  ;;  %v480_v14 = vld [vmem:[%s1299_s4 + $0x28] sm:$0xff]  ;;  %v644_v18 = vld [vmem:[%s1301_s6 + $0x10] sm:$0xff]  ;;  %s338_s26 = scalar_lea.vmem [#allocation2], %s858_s24 }
  0x19   : > { %970 = vset.pattern.permute.xlu2 %v1046_v2  ;;  %s347_s14 = scalar_lea.vmem %s1310_s0, %s860_s27  ;;  %v475_v16 = vld [vmem:[%s1299_s4] sm:$0xff]  ;;  %v921_v17 = vld [vmem:[%s1311_s1 + $0x8] sm:$0xff]  ;;  %v645_v19 = vld [vmem:[%s1301_s6 + $0x18] sm:$0xff]  ;;  %s1243_s27 = scalar_lea.sflag [#allocation3], %s336_s23 }
  0x1a   : > { %v359_v4 = vld [vmem:[%s347_s14] sm:$0x77]  ;;  %v643_v20 = vld [vmem:[%s1301_s6 + $0x8] sm:$0xff]  ;;  %v481_v30 = vld [vmem:[%s1299_s4 + $0x30] sm:$0xff]  ;;  %s780_s28 = ssub.s32 (%p1136_p5), 3, %s1153_s25 }
  0x1b   : > { %v399_v6 = vunpack.c.l.b16 %v359_v4  ;;  %v400_v7 = vunpack.c.h.b16 %v359_v4  ;;  %v734_v21 = vld [vmem:[%s1303_s8] sm:$0x3f]  ;;  %515 = vperm.xlu2 %970, %v481_v30   ;;  %v482_v56 = vld [vmem:[%s1299_s4 + $0x38] sm:$0xff]  ;;  %v477_v57 = vld [vmem:[%s1299_s4 + $0x10] sm:$0xff]  ;;  %p781_p11 = scmp.lt.s32.totalorder (%p1136_p5), %s780_s28, 2 }
  0x1c   : > { %v922_v55 = vld [vmem:[%s1298_s3] sm:$0xff]  ;;  %v923_v58 = vld [vmem:[%s1298_s3 + $0x8] sm:$0xff]  ;;  %v924_v61 = vld [vmem:[%s1298_s3 + $0x10] sm:$0xff] }
  0x1d   : > { %v401_v8 = vpack.c.b16 %v399_v6, %v399_v6  ;;  %v402_v9 = vpack.c.b16 %v400_v7, %v400_v7  ;;  %v476_v59 = vld [vmem:[%s1299_s4 + $0x8] sm:$0xff]  ;;  %v642_v60 = vld [vmem:[%s1301_s6] sm:$0xff]  ;;  %v925_v62 = vld [vmem:[%s1298_s3 + $0x18] sm:$0xff] }
  0x1f   : > { %v412_v10 = vsel %vm410_vm0, %v401_v8, 0  ;;  %v415_v11 = vsel %vm410_vm0, %v402_v9, 0 }
  0x20   : > { %385 = vperm.xlu0 %968, %v367_v3   ;;  %375 = vperm.xlu1 %969, %v365_v5  }
  0x21   : > { %424 = vmatpush.bf16.msra.mxu0 %v412_v10  ;;  %443 = vmatpush.bf16.msra.mxu1 %v415_v11 }
  0x23   : > { %520 = vperm.xlu2 %970, %v482_v56  }
  0x24   : > { %869 = vmatmul.msk.bf16.vlgmr.msra.gmra.mxu0 %vm403_vm1, %v920_v12  ;;  %871 = vmatmul.msk.bf16.vlgmr.msra.gmra.mxu1 %vm403_vm1, %v920_v12 }
  0x28   : > { %505 = vperm.xlu0 %968, %v479_v13   ;;  %510 = vperm.xlu1 %969, %v480_v14  }
  0x2b   : > { %495 = vperm.xlu2 %970, %v477_v57  }
  0x30   : > { %500 = vperm.xlu0 %968, %v478_v15   ;;  %485 = vperm.xlu1 %969, %v475_v16  }
  0x33   : > { %490 = vperm.xlu2 %970, %v476_v59  }
  0x34   : > { %870 = vmatmul.msk.bf16.gmra.mxu0 %vm403_vm1, %v921_v17  ;;  %872 = vmatmul.msk.bf16.gmra.mxu1 %vm403_vm1, %v921_v17 }
  0x38   : > { %658 = vperm.xlu0 %968, %v644_v18   ;;  %663 = vperm.xlu1 %969, %v645_v19  }
  0x3b   : > { %648 = vperm.xlu2 %970, %v642_v60  }
  0x40   : > { %653 = vperm.xlu0 %968, %v643_v20   ;;  %737 = vperm.xlu1 %969, %v734_v21  }
  0x75   : > { %v516_v7 = vpop.permute.xlu2 %515 }
  0x7d   : > { %v521_v12 = vpop.permute.xlu2 %520 }
  0x85   : > { %v496_v16 = vpop.permute.xlu2 %495 }
  0x8a   : > { %v381_v26 = vpop.permute.xlu0 %380  ;;  %v371_v27 = vpop.permute.xlu1 %370 }
  0x92   : > { %v386_v31 = vpop.permute.xlu0 %385  ;;  %v376_v32 = vpop.permute.xlu1 %375 }
  0x9a   : > { %v506_v15 = vpop.permute.xlu0 %505  ;;  %v511_v17 = vpop.permute.xlu1 %510 }
  0xa1   : > { %v426_v22 = vpop.f32.mrf.mxu0  ;;  %v445_v23 = vpop.f32.mrf.mxu1 }
  0xa2   : > { %v427_v41 = vadd.f32 %v426_v22, %v371_v27  ;;  %v446_v42 = vadd.f32 %v445_v23, %v371_v27 }
  0xa4   : > { %v455_v51 = vmax.f32 %v427_v41, 0.0  ;;  %v456_v52 = vmax.f32 %v446_v42, 0.0 }
  0xa9   : > { %v428_v24 = vpop.f32.mrf.mxu0  ;;  %v447_v25 = vpop.f32.mrf.mxu1 }
  0xaa   : > { %v429_v37 = vadd.f32 %v428_v24, %v376_v32  ;;  %v448_v38 = vadd.f32 %v447_v25, %v376_v32 }
  0xac   : > { %v457_v47 = vmax.f32 %v429_v37, 0.0  ;;  %v458_v48 = vmax.f32 %v448_v38, 0.0 }
  0xae   : > { %v463_v53 = vpack.c.bf16 %v457_v47, %v455_v51  ;;  %v464_v54 = vpack.c.bf16 %v458_v48, %v456_v52 }
  0xb1   : > { %v431_v28 = vpop.f32.mrf.mxu0  ;;  %v450_v29 = vpop.f32.mrf.mxu1 }
  0xb2   : > { %v432_v33 = vadd.f32 %v431_v28, %v381_v26  ;;  %v451_v34 = vadd.f32 %v450_v29, %v381_v26  ;;  %v501_v28 = vpop.permute.xlu0 %500 }
  0xb4   : > { %v459_v43 = vmax.f32 %v432_v33, 0.0  ;;  %v460_v44 = vmax.f32 %v451_v34, 0.0 }
  0xb9   : > { %v433_v35 = vpop.f32.mrf.mxu0  ;;  %v452_v36 = vpop.f32.mrf.mxu1 }
  0xba   : > { %v434_v39 = vadd.f32 %v433_v35, %v386_v31  ;;  %v453_v40 = vadd.f32 %v452_v36, %v386_v31  ;;  %v491_v35 = vpop.permute.xlu2 %490 }
  0xbc   : > { %v461_v45 = vmax.f32 %v434_v39, 0.0  ;;  %v462_v46 = vmax.f32 %v453_v40, 0.0 }
  0xbe   : > { %v465_v49 = vpack.c.bf16 %v461_v45, %v459_v43  ;;  %v466_v50 = vpack.c.bf16 %v462_v46, %v460_v44 }
  0xc0   : > { %562 = vmatpush.bf16.msra.mxu2 %v465_v49  ;;  %591 = vmatpush.bf16.msra.mxu3 %v466_v50  ;;  %v486_v50 = vpop.permute.xlu1 %485 }
  0xc4   : > { %563 = vmatpush.bf16.msra.mxu2 %v463_v53  ;;  %592 = vmatpush.bf16.msra.mxu3 %v464_v54 }
  0xc7   : > { %889 = vmatmul.msk.bf16.vlgmr.msra.gmra.mxu2 %vm543_vm2, %v922_v55  ;;  %893 = vmatmul.msk.bf16.vlgmr.msra.gmra.mxu3 %vm543_vm2, %v922_v55 }
  0xd7   : > { %890 = vmatmul.msk.bf16.gmra.mxu2 %vm543_vm2, %v923_v58  ;;  %894 = vmatmul.msk.bf16.gmra.mxu3 %vm543_vm2, %v923_v58 }
  0xe7   : > { %891 = vmatmul.msk.bf16.gmra.mxu2 %vm543_vm2, %v924_v61  ;;  %895 = vmatmul.msk.bf16.gmra.mxu3 %vm543_vm2, %v924_v61 }
  0xf7   : > { %892 = vmatmul.msk.bf16.gmra.mxu2 %vm543_vm2, %v925_v62  ;;  %896 = vmatmul.msk.bf16.gmra.mxu3 %vm543_vm2, %v925_v62 }
 0x14a   : > { %v565_v63 = vpop.f32.mrf.mxu2  ;;  %v594_v0 = vpop.f32.mrf.mxu3 }
 0x14b   : > { %v566_v51 = vadd.f32 %v565_v63, %v486_v50  ;;  %v595_v52 = vadd.f32 %v594_v0, %v486_v50  ;;  %v927_v63 = vld [vmem:[%s1300_s5 + $0x8] sm:$0xff] }
 0x14d   : > { %v614_v59 = vmax.f32 %v566_v51, 0.0  ;;  %v615_v60 = vmax.f32 %v595_v52, 0.0 }
 0x152   : > { %v567_v1 = vpop.f32.mrf.mxu2  ;;  %v596_v2 = vpop.f32.mrf.mxu3 }
 0x153   : > { %v568_v44 = vadd.f32 %v567_v1, %v491_v35  ;;  %v597_v45 = vadd.f32 %v596_v2, %v491_v35  ;;  %v926_v1 = vld [vmem:[%s1300_s5] sm:$0xff] }
 0x155   : > { %v616_v55 = vmax.f32 %v568_v44, 0.0  ;;  %v617_v56 = vmax.f32 %v597_v45, 0.0 }
 0x157   : > { %v630_v61 = vpack.c.bf16 %v616_v55, %v614_v59  ;;  %v631_v62 = vpack.c.bf16 %v617_v56, %v615_v60 }
 0x15a   : > { %v570_v3 = vpop.f32.mrf.mxu2  ;;  %v599_v4 = vpop.f32.mrf.mxu3 }
 0x15b   : > { %v571_v40 = vadd.f32 %v570_v3, %v496_v16  ;;  %v600_v41 = vadd.f32 %v599_v4, %v496_v16 }
 0x15d   : > { %v618_v53 = vmax.f32 %v571_v40, 0.0  ;;  %v619_v54 = vmax.f32 %v600_v41, 0.0 }
 0x162   : > { %v572_v5 = vpop.f32.mrf.mxu2  ;;  %v601_v6 = vpop.f32.mrf.mxu3 }
 0x163   : > { %v573_v33 = vadd.f32 %v572_v5, %v501_v28  ;;  %v602_v34 = vadd.f32 %v601_v6, %v501_v28  ;;  %v659_v5 = vpop.permute.xlu0 %658 }
 0x165   : > { %v620_v46 = vmax.f32 %v573_v33, 0.0  ;;  %v621_v47 = vmax.f32 %v602_v34, 0.0  ;;  %v733_v33 = vld [vmem:[%s1302_s7] sm:$0x7] }
 0x167   : > { %v632_v57 = vpack.c.bf16 %v620_v46, %v618_v53  ;;  %v633_v58 = vpack.c.bf16 %v621_v47, %v619_v54 }
 0x16a   : > { %v575_v8 = vpop.f32.mrf.mxu2  ;;  %v604_v9 = vpop.f32.mrf.mxu3 }
 0x16b   : > { %v576_v26 = vadd.f32 %v575_v8, %v506_v15  ;;  %v605_v27 = vadd.f32 %v604_v9, %v506_v15  ;;  %v664_v8 = vpop.permute.xlu1 %663  ;;  %v654_v9 = vpop.permute.xlu0 %653 }
 0x16d   : > { %v622_v42 = vmax.f32 %v576_v26, 0.0  ;;  %v623_v43 = vmax.f32 %v605_v27, 0.0 }
 0x172   : > { %v577_v10 = vpop.f32.mrf.mxu2  ;;  %v606_v11 = vpop.f32.mrf.mxu3 }
 0x173   : > { %v578_v22 = vadd.f32 %v577_v10, %v511_v17  ;;  %v607_v23 = vadd.f32 %v606_v11, %v511_v17  ;;  %v738_v34 = vpop.permute.xlu1 %737 }
 0x175   : > { %v624_v36 = vmax.f32 %v578_v22, 0.0  ;;  %v625_v37 = vmax.f32 %v607_v23, 0.0 }
 0x177   : > { %v634_v48 = vpack.c.bf16 %v624_v36, %v622_v42  ;;  %v635_v49 = vpack.c.bf16 %v625_v37, %v623_v43 }
 0x17a   : > { %v580_v13 = vpop.f32.mrf.mxu2  ;;  %v609_v14 = vpop.f32.mrf.mxu3 }
 0x17b   : > { %v581_v18 = vadd.f32 %v580_v13, %v516_v7  ;;  %v610_v19 = vadd.f32 %v609_v14, %v516_v7  ;;  %v649_v14 = vpop.permute.xlu2 %648 }
 0x17d   : > { %v626_v29 = vmax.f32 %v581_v18, 0.0  ;;  %v627_v30 = vmax.f32 %v610_v19, 0.0 }
 0x182   : > { %v582_v20 = vpop.f32.mrf.mxu2  ;;  %v611_v21 = vpop.f32.mrf.mxu3 }
 0x183   : > { %v583_v24 = vadd.f32 %v582_v20, %v521_v12  ;;  %v612_v25 = vadd.f32 %v611_v21, %v521_v12 }
 0x185   : > { %v628_v31 = vmax.f32 %v583_v24, 0.0  ;;  %v629_v32 = vmax.f32 %v612_v25, 0.0 }
 0x187   : > { %v636_v38 = vpack.c.bf16 %v628_v31, %v626_v29  ;;  %v637_v39 = vpack.c.bf16 %v629_v32, %v627_v30 }
 0x189   : > { %687 = vmatpush.bf16.msrb.mxu0 %v636_v38  ;;  %706 = vmatpush.bf16.msrb.mxu1 %v637_v39 }
 0x18d   : > { %688 = vmatpush.bf16.msrb.mxu0 %v634_v48  ;;  %707 = vmatpush.bf16.msrb.mxu1 %v635_v49 }
 0x191   : > { %689 = vmatpush.bf16.msrb.mxu0 %v632_v57  ;;  %708 = vmatpush.bf16.msrb.mxu1 %v633_v58 }
 0x195   : > { %690 = vmatpush.bf16.msrb.mxu0 %v630_v61  ;;  %709 = vmatpush.bf16.msrb.mxu1 %v631_v62 }
 0x198   : > { %905 = vmatmul.msk.bf16.vlgmr.msrb.gmra.mxu0 %vm676_vm3, %v926_v1  ;;  %907 = vmatmul.msk.bf16.vlgmr.msrb.gmra.mxu1 %vm676_vm3, %v926_v1 }
 0x1a8   : > { %906 = vmatmul.msk.bf16.gmra.mxu0 %vm676_vm3, %v927_v63  ;;  %908 = vmatmul.msk.bf16.gmra.mxu1 %vm676_vm3, %v927_v63 }
 0x215   : > { %v692_v0 = vpop.f32.mrf.mxu0  ;;  %v711_v2 = vpop.f32.mrf.mxu1 }
 0x216   : > { %v693_v19 = vadd.f32 %v692_v0, %v649_v14  ;;  %v712_v20 = vadd.f32 %v711_v2, %v649_v14 }
 0x218   : > { %v721_v29 = vmax.f32 %v693_v19, 0.0  ;;  %v722_v30 = vmax.f32 %v712_v20, 0.0 }
 0x21d   : > { %v694_v3 = vpop.f32.mrf.mxu0  ;;  %v713_v4 = vpop.f32.mrf.mxu1 }
 0x21e   : > { %v695_v15 = vadd.f32 %v694_v3, %v654_v9  ;;  %v714_v16 = vadd.f32 %v713_v4, %v654_v9 }
 0x220   : > { %v723_v25 = vmax.f32 %v695_v15, 0.0  ;;  %v724_v26 = vmax.f32 %v714_v16, 0.0 }
 0x222   : > { %v729_v31 = vpack.c.bf16 %v723_v25, %v721_v29  ;;  %v730_v32 = vpack.c.bf16 %v724_v26, %v722_v30 }
 0x225   : > { %v697_v6 = vpop.f32.mrf.mxu0  ;;  %v716_v7 = vpop.f32.mrf.mxu1 }
 0x226   : > { %v698_v10 = vadd.f32 %v697_v6, %v659_v5  ;;  %v717_v11 = vadd.f32 %v716_v7, %v659_v5 }
 0x228   : > { %v725_v21 = vmax.f32 %v698_v10, 0.0  ;;  %v726_v22 = vmax.f32 %v717_v11, 0.0 }
 0x22d   : > { %v699_v12 = vpop.f32.mrf.mxu0  ;;  %v718_v13 = vpop.f32.mrf.mxu1 }
 0x22e   : > { %v700_v17 = vadd.f32 %v699_v12, %v664_v8  ;;  %v719_v18 = vadd.f32 %v718_v13, %v664_v8 }
 0x230   : > { %v727_v23 = vmax.f32 %v700_v17, 0.0  ;;  %v728_v24 = vmax.f32 %v719_v18, 0.0 }
 0x232   : > { %v731_v27 = vpack.c.bf16 %v727_v23, %v725_v21  ;;  %v732_v28 = vpack.c.bf16 %v728_v24, %v726_v22 }
 0x234   : > { %749 = vmatpush.bf16.msra.mxu0 %v731_v27  ;;  %762 = vmatpush.bf16.msra.mxu1 %v732_v28 }
 0x238   : > { %750 = vmatpush.bf16.msra.mxu0 %v729_v31  ;;  %763 = vmatpush.bf16.msra.mxu1 %v730_v32 }
 0x23b   : > { %909 = vmatmul.msk.bf16.vlgmr.msra.gmra.mxu0 %vm543_vm2, %v733_v33  ;;  %910 = vmatmul.msk.bf16.vlgmr.msra.gmra.mxu1 %vm543_vm2, %v733_v33 }
 0x2b8   : > { %v752_v35 = vpop.f32.mrf.mxu0  ;;  %v765_v36 = vpop.f32.mrf.mxu1 }
 0x2b9   : > { %v753_v37 = vadd.f32 %v752_v35, %v738_v34  ;;  %v766_v38 = vadd.f32 %v765_v36, %v738_v34 }
 0x2bb   : > { %769 = vst [vmem:[%s338_s26] sm:$0x3f] %v753_v37 }
 0x2bc   : > { %770 = vst [vmem:[%s338_s26 + $0x8] sm:$0x3f] %v766_v38  ;;  %778 = sbr.rel (!%p1136_p5) target bundleno = 736 (0x2e0), region = 60 }
 0x2c0   : > { %v754_v39 = vpop.f32.mrf.mxu0  ;;  %v767_v40 = vpop.f32.mrf.mxu1 }
 0x2c1   : > { %s1319_s28 = smov (!%p781_p11, %s780_s28), 2 }
 0x2c2   : > { %s913_s29 = sshll.u32 %s1319_s28, 3 }
 0x2c3   : > { %s784_s14 = ssub.s32 16, %s913_s29 }
 0x2c4   : > { %s785_s16 = sshll.u32 %s784_s14, 4 }
 0x2c5   : > { %786 = vsyncadd %s1243_s27, %s785_s16  ;;  %p1252_p12 = scmp.ne.s32.totalorder %s913_s29, 0  ;;  %s928_s19 = sshll.u32 %s1119_s13, 4 }
 0x2c6   : > { %s789_s25 = scalar_lea.hbm %s1304_s9, %s928_s19  ;;  %s1305_s23 = sshll.u32 %s1319_s28, 7 }
 0x2c7   : > { %s792_s24 = sshll.u32 %s338_s26, 4  ;;  %s794_s0 = sshll.u32 %s789_s25, 4  ;;  %s793_s24 = int_to_ptr.vmem [resolvable:$true] %s792_s24  ;;  %s795_s0 = int_to_ptr.hbm [resolvable:$true] %s794_s0 }
 0x2c8   : > { %s971_s14 = sshra.s32 %s793_s24, 4  ;;  %s973_s16 = sshrl.u32 %s1305_s23, 4  ;;  %s972_s14 = int_to_ptr.vmem [resolvable:$true] %s971_s14 }
 0x2c9   : > { %s978_s1 = scalar_lea.vmem %s972_s14, %s973_s16  ;;  %s1047_s29 = smov [#allocation2]  }
 0x2ca   : > { %p979_p13 = scmp.ne.s32.totalorder %s972_s14, %s978_s1  ;;  %s982_s13 = scalar_lea.vmem %s1047_s29, 32 }
 0x2cb   : > { %p984_p2 = scmp.lt.s32.totalorder %s982_s13, %s978_s1 }
 0x2cc   : > { %p980_p0 = pnand %p979_p13, %p1252_p12 }
 0x2ce   : > { %p981_p1 = pneg %p980_p0 }
 0x2d0   : > { %p986_p3 = pnand %p984_p2, %p981_p1 }
 0x2d2   : > { %989 = shalt.err (!%p986_p3)
}
 0x2d3   : > { %s990_s19 = sshra.s32 %s795_s0, 4  ;;  %s1001_s25 = scalar_lea.hbm %s1304_s9, 24  ;;  %s991_s19 = int_to_ptr.hbm [resolvable:$true] %s990_s19 }
 0x2d4   : > { %s997_s26 = scalar_lea.hbm %s991_s19, %s973_s16  ;;  %p1002_p8 = scmp.lt.s32.totalorder %s991_s19, %s1304_s9 }
 0x2d5   : > { %p998_p4 = scmp.ne.s32.totalorder %s991_s19, %s997_s26  ;;  %p1003_p9 = scmp.lt.s32.totalorder %s1001_s25, %s997_s26 }
 0x2d7   : > { %p999_p5 = pnand %p998_p4, %p1252_p12  ;;  %p1004_p10 = por %p1003_p9, %p1002_p8 }
 0x2d9   : > { %p1000_p7 = pneg %p999_p5 }
 0x2db   : > { %p1005_p11 = pnand %p1004_p10, %p1000_p7 }
 0x2dd   : > { %1008 = shalt.err (!%p1005_p11)
}
 0x2de   : > { %s1313_s1 = sshll.u32 %s1319_s28, 7 }
 0x2df   : > { %797 = dma.vmem_to_hbm [thread:$0]  (%p1252_p12), %s793_s24, %s1313_s1, %s795_s0, %s1243_s27  }
 0x2e0 PF: > { %p934_p13 = scmp.ge.s32.totalorder %s1044_s12, 2  ;;  %s806_s16 = sand.u32 1, %s1032_s30  }
 0x2e1   : > { %s807_s23 = scalar_lea.sflag [#allocation3], %s806_s16 }
 0x2e2   : > { %p931_p0 = pnand %p934_p13, %p1140_p6 }
 0x2e4   : > { %p932_p1 = pneg %p931_p0 }
 0x2e6   : > { %1027 = dma.done.wait (%p932_p1), %s807_s23, 256  }
 0x2e7   : > { %1029 = vsyncadd (%p932_p1), %s807_s23, 4294967040  ;;  %p19_p2 = scmp.ge.s32.totalorder %s1123_s15, 4   ;;  %s1314_s30 = smov %s1036_s10 }
 0x2e8   : > { %s1315_s10 = smov %s1040_s11  ;;  %s1316_s11 = smov %s1134_s18 }
 0x2e9   : > { %s1317_s12 = smov %s1123_s15  ;;  %21 = sbr.rel (!%p19_p2) target bundleno = 6 (0x6), region = 91 }
 0x2ee   :  { %813 = vsyncpa [#allocation3], 1 }
 0x2ef   :  { %815 = vsyncpa [#allocation3 + $0x1], 1 }

</bundles_post_ra>
